<compile_context>
chip_gen: v5e
topology: v5e:2x2
jax: 0.10.0
libtpu: 0.0.40
codegen_flags: <defaults>
</compile_context>

<pallas_src>
import jax
import jax.numpy as jnp
import numpy as np
from jax.experimental import pallas as pl
from jax.experimental.pallas import tpu as pltpu


def _complex_score_kernel(sr_ref, si_ref, rr_ref, ri_ref, or_ref, oi_ref, out_ref):
    # Blocks are [C, tile_e]: channels on sublanes, edges on lanes.
    f32 = jnp.float32
    sr = sr_ref[...].astype(f32)
    si = si_ref[...].astype(f32)
    rr = rr_ref[...].astype(f32)
    ri = ri_ref[...].astype(f32)
    o_r = or_ref[...].astype(f32)
    o_i = oi_ref[...].astype(f32)
    # Re( s * r * conj(o) ) per channel, factored to 6 multiplies.
    term = rr * (sr * o_r + si * o_i) + ri * (sr * o_i - si * o_r)
    # Reduce over channels (sublane axis) -> lane-dense [1, tile_e] row.
    out_ref[...] = jnp.sum(term, axis=0, keepdims=True)


def complex_scores_pallas(sr, si, rr, ri, o_r, o_i, *, tile_e=512):
    """Inputs are [C, E] (bf16 or f32); returns f32 scores of shape [E]."""
    C, E = sr.shape
    n_tiles = pl.cdiv(E, tile_e)
    e_pad = n_tiles * tile_e

    operands = [sr, si, rr, ri, o_r, o_i]
    if e_pad != E:
        pad = ((0, 0), (0, e_pad - E))
        operands = [jnp.pad(a, pad) for a in operands]

    in_spec = pl.BlockSpec((C, tile_e), lambda i: (0, i))
    out_spec = pl.BlockSpec((1, tile_e), lambda i: (0, i))

    out = pl.pallas_call(
        _complex_score_kernel,
        out_shape=jax.ShapeDtypeStruct((1, e_pad), jnp.float32),
        grid_spec=pltpu.PrefetchScalarGridSpec(
            num_scalar_prefetch=0,
            grid=(n_tiles,),
            in_specs=[in_spec] * 6,
            out_specs=out_spec,
        ),
        compiler_params=pltpu.CompilerParams(
            dimension_semantics=("parallel",),
            vmem_limit_bytes=32 * 1024 * 1024,
        ),
    )(*operands)
    return out[0, :E]


class ComplExPallas:
    """JAX/Pallas port of the ComplEx module (synthetic deterministic params).

    Parameters are stored transposed ([n_channels, n_*]) and in bf16 so the
    per-edge gathered operands are already in the lane-dense [C, E] layout the
    kernel wants and HBM traffic is halved; all arithmetic is done in f32.
    """

    def __init__(self, n_relations, n_entities, n_channels=50, *, key=None,
                 param_dtype=jnp.bfloat16):
        if key is None:
            key = jax.random.PRNGKey(0)
        k1, k2, k3, k4 = jax.random.split(key, 4)
        # torch.randn(..., dtype=torch.complex64): independent normal re/im parts.
        self.ent_re = jax.random.normal(
            k1, (n_channels, n_entities), jnp.float32).astype(param_dtype)
        self.ent_im = jax.random.normal(
            k2, (n_channels, n_entities), jnp.float32).astype(param_dtype)
        self.rel_re = jax.random.normal(
            k3, (n_channels, n_relations), jnp.float32).astype(param_dtype)
        self.rel_im = jax.random.normal(
            k4, (n_channels, n_relations), jnp.float32).astype(param_dtype)
        self.n_channels = n_channels

    def forward(self, edge_index, edge_type):
        src = edge_index[0]
        dst = edge_index[1]
        # Column gathers keep the lane-dense [C, E] layout for the kernel.
        sr = self.ent_re[:, src]
        si = self.ent_im[:, src]
        o_r = self.ent_re[:, dst]
        o_i = self.ent_im[:, dst]
        rr = self.rel_re[:, edge_type]
        ri = self.rel_im[:, edge_type]
        return complex_scores_pallas(sr, si, rr, ri, o_r, o_i)


if __name__ == "__main__":
    n_entities = 64
    n_relations = 8
    n_channels = 32
    n_edges = 1000  # not a multiple of tile_e -> exercises the padded tail

    key = jax.random.PRNGKey(0)
    k_model, k_src, k_dst, k_rel = jax.random.split(key, 4)

    model = ComplExPallas(n_relations, n_entities, n_channels, key=k_model)

    src = jax.random.randint(k_src, (n_edges,), 0, n_entities, dtype=jnp.int32)
    dst = jax.random.randint(k_dst, (n_edges,), 0, n_entities, dtype=jnp.int32)
    edge_index = jnp.stack([src, dst], axis=0)                   # [2, E]
    edge_type = jax.random.randint(k_rel, (n_edges,), 0, n_relations, dtype=jnp.int32)

    scores = model.forward(edge_index, edge_type)
    scores = jax.block_until_ready(scores)

    # Pure-JAX f32 reference built from the same (bf16-stored) parameters.
    ent = (model.ent_re.astype(jnp.float32).T
           + 1j * model.ent_im.astype(jnp.float32).T)            # [n_ent, C]
    rel = (model.rel_re.astype(jnp.float32).T
           + 1j * model.rel_im.astype(jnp.float32).T)            # [n_rel, C]
    ref = jnp.real(
        jnp.sum(ent[src] * rel[edge_type] * jnp.conj(ent[dst]), axis=-1)
    )

    assert scores.shape == (n_edges,)
    assert np.allclose(np.asarray(scores), np.asarray(ref), rtol=1e-3, atol=1e-3)

    print("KERNEL_OK")
</pallas_src>

<mosaic_0001>
module attributes {stable_mosaic.version = 11 : i64} {
  func.func @_complex_score_kernel(%arg0: i32, %arg1: memref<32x512xbf16, #tpu.memory_space<vmem>>, %arg2: memref<32x512xbf16, #tpu.memory_space<vmem>>, %arg3: memref<32x512xbf16, #tpu.memory_space<vmem>>, %arg4: memref<32x512xbf16, #tpu.memory_space<vmem>>, %arg5: memref<32x512xbf16, #tpu.memory_space<vmem>>, %arg6: memref<32x512xbf16, #tpu.memory_space<vmem>>, %arg7: memref<1x512xf32, #tpu.memory_space<vmem>>) attributes {dimension_semantics = [#tpu.dimension_semantics<parallel>], iteration_bounds = array<i64: 2>, scalar_prefetch = 0 : i64, scratch_operands = 0 : i64, tpu.core_type = #tpu.core_type<tc>, window_params = [{transform_indices = @transform_0, window_bounds = array<i64: 32, 512>}, {transform_indices = @transform_1, window_bounds = array<i64: 32, 512>}, {transform_indices = @transform_2, window_bounds = array<i64: 32, 512>}, {transform_indices = @transform_3, window_bounds = array<i64: 32, 512>}, {transform_indices = @transform_4, window_bounds = array<i64: 32, 512>}, {transform_indices = @transform_5, window_bounds = array<i64: 32, 512>}, {transform_indices = @transform_6, window_bounds = array<i64: 1, 512>}]} {
    %c0 = arith.constant 0 : index
    %c0_0 = arith.constant 0 : index
    %0 = vector.load %arg1[%c0, %c0_0] : memref<32x512xbf16, #tpu.memory_space<vmem>>, vector<32x512xbf16>
    %1 = arith.extf %0 : vector<32x512xbf16> to vector<32x512xf32>
    %c0_1 = arith.constant 0 : index
    %c0_2 = arith.constant 0 : index
    %2 = vector.load %arg2[%c0_1, %c0_2] : memref<32x512xbf16, #tpu.memory_space<vmem>>, vector<32x512xbf16>
    %3 = arith.extf %2 : vector<32x512xbf16> to vector<32x512xf32>
    %c0_3 = arith.constant 0 : index
    %c0_4 = arith.constant 0 : index
    %4 = vector.load %arg3[%c0_3, %c0_4] : memref<32x512xbf16, #tpu.memory_space<vmem>>, vector<32x512xbf16>
    %5 = arith.extf %4 : vector<32x512xbf16> to vector<32x512xf32>
    %c0_5 = arith.constant 0 : index
    %c0_6 = arith.constant 0 : index
    %6 = vector.load %arg4[%c0_5, %c0_6] : memref<32x512xbf16, #tpu.memory_space<vmem>>, vector<32x512xbf16>
    %7 = arith.extf %6 : vector<32x512xbf16> to vector<32x512xf32>
    %c0_7 = arith.constant 0 : index
    %c0_8 = arith.constant 0 : index
    %8 = vector.load %arg5[%c0_7, %c0_8] : memref<32x512xbf16, #tpu.memory_space<vmem>>, vector<32x512xbf16>
    %9 = arith.extf %8 : vector<32x512xbf16> to vector<32x512xf32>
    %c0_9 = arith.constant 0 : index
    %c0_10 = arith.constant 0 : index
    %10 = vector.load %arg6[%c0_9, %c0_10] : memref<32x512xbf16, #tpu.memory_space<vmem>>, vector<32x512xbf16>
    %11 = arith.extf %10 : vector<32x512xbf16> to vector<32x512xf32>
    %12 = arith.mulf %1, %9 : vector<32x512xf32>
    %13 = arith.mulf %3, %11 : vector<32x512xf32>
    %14 = arith.addf %12, %13 : vector<32x512xf32>
    %15 = arith.mulf %5, %14 : vector<32x512xf32>
    %16 = arith.mulf %1, %11 : vector<32x512xf32>
    %17 = arith.mulf %3, %9 : vector<32x512xf32>
    %18 = arith.subf %16, %17 : vector<32x512xf32>
    %19 = arith.mulf %7, %18 : vector<32x512xf32>
    %20 = arith.addf %15, %19 : vector<32x512xf32>
    %cst = arith.constant dense<0.000000e+00> : vector<512xf32>
    %21 = vector.multi_reduction <add>, %20, %cst [0] : vector<32x512xf32> to vector<512xf32>
    %22 = vector.shape_cast %21 : vector<512xf32> to vector<1x512xf32>
    %c0_11 = arith.constant 0 : index
    %c0_12 = arith.constant 0 : index
    %23 = vector.load %arg7[%c0_11, %c0_12] : memref<1x512xf32, #tpu.memory_space<vmem>>, vector<1x512xf32>
    tpu.vector_store %arg7[%c0_11, %c0_12], %22 {strides = array<i32>} : memref<1x512xf32, #tpu.memory_space<vmem>>, vector<1x512xf32>,
    return
  }
  func.func @transform_0(%arg0: i32) -> (i32, i32) {
    %c0_i32 = arith.constant 0 : i32
    %c0_i32_0 = arith.constant 0 : i32
    return %c0_i32, %arg0 : i32, i32
  }
  func.func @transform_1(%arg0: i32) -> (i32, i32) {
    %c0_i32 = arith.constant 0 : i32
    %c0_i32_0 = arith.constant 0 : i32
    return %c0_i32, %arg0 : i32, i32
  }
  func.func @transform_2(%arg0: i32) -> (i32, i32) {
    %c0_i32 = arith.constant 0 : i32
    %c0_i32_0 = arith.constant 0 : i32
    return %c0_i32, %arg0 : i32, i32
  }
  func.func @transform_3(%arg0: i32) -> (i32, i32) {
    %c0_i32 = arith.constant 0 : i32
    %c0_i32_0 = arith.constant 0 : i32
    return %c0_i32, %arg0 : i32, i32
  }
  func.func @transform_4(%arg0: i32) -> (i32, i32) {
    %c0_i32 = arith.constant 0 : i32
    %c0_i32_0 = arith.constant 0 : i32
    return %c0_i32, %arg0 : i32, i32
  }
  func.func @transform_5(%arg0: i32) -> (i32, i32) {
    %c0_i32 = arith.constant 0 : i32
    %c0_i32_0 = arith.constant 0 : i32
    return %c0_i32, %arg0 : i32, i32
  }
  func.func @transform_6(%arg0: i32) -> (i32, i32) {
    %c0_i32 = arith.constant 0 : i32
    %c0_i32_0 = arith.constant 0 : i32
    return %c0_i32, %arg0 : i32, i32
  }
}

</mosaic_0001>

<bundles_post_ra>
// kernel: tpu_custom_call.1
= control target key start
LH: loop header
LB: loop body
LE: loop exit
PB: predicated region body
PF: predicated region fallthrough
CT: control target
= control target key end

     0   :  { %s2303_s0 = inlined_call_operand.hbm [shape: bf16[32,1024], index: 0, kind: input, shape index: {}]   ;;  %s2304_s1 = inlined_call_operand.hbm [shape: bf16[32,1024], index: 1, kind: input, shape index: {}]   ;;  %s2305_s2 = inlined_call_operand.hbm [shape: bf16[32,1024], index: 2, kind: input, shape index: {}]   ;;  %s2306_s3 = inlined_call_operand.hbm [shape: bf16[32,1024], index: 3, kind: input, shape index: {}]   ;;  %s2307_s4 = inlined_call_operand.hbm [shape: bf16[32,1024], index: 4, kind: input, shape index: {}]   ;;  %s2308_s5 = inlined_call_operand.hbm [shape: bf16[32,1024], index: 5, kind: input, shape index: {}]   ;;  %s2309_s6 = inlined_call_operand.hbm [shape: f32[1,1024], index: 6, kind: output, shape index: {}]  }
   0x1   :  { %2400 = sst [smem:[#allocation67_spill]] %s2304_s1 }
   0x2   :  { %2401 = sst [smem:[#allocation68_spill]] %s2306_s3 }
   0x3   :  { %2402 = sst [smem:[#allocation69_spill]] %s2309_s6 }
   0x4   :  { %11 = vsyncpa [#allocation3], 0 }
   0x5   :  { %13 = vsyncpa [#allocation3 + $0x1], 0 }
   0x6   :  { %14 = vsyncpa [#allocation6], 0 }
   0x7   :  { %16 = vsyncpa [#allocation6 + $0x1], 0 }
   0x8   :  { %17 = vsyncpa [#allocation9], 0 }
   0x9   :  { %19 = vsyncpa [#allocation9 + $0x1], 0 }
   0xa   :  { %20 = vsyncpa [#allocation12], 0 }
   0xb   :  { %22 = vsyncpa [#allocation12 + $0x1], 0 }
   0xc   :  { %23 = vsyncpa [#allocation4], 0 }
   0xd   :  { %25 = vsyncpa [#allocation4 + $0x1], 0  ;;  %s1432_s21 = smov 0   ;;  %s1434_s22 = smov 0  }
   0xe   :  { %s1436_s23 = smov 0   ;;  %s1438_s24 = smov 0  }
   0xf LB: > { %2403 = sst [smem:[#allocation19_spill]] %s1380_s21  ;;  %s1453_s25 = sadd.s32 4294967295, %s1392_s24   ;;  %s1392_s24 = sphi %s1438_s24, %s2662_s24   ;;  %s1388_s23 = sphi %s1436_s23, %s2664_s23   ;;  %s1384_s22 = sphi %s1434_s22, %s2666_s22   ;;  %s1380_s21 = sphi %s1432_s21, %s2665_s21  }
  0x10   : > { %2404 = sst [smem:[#allocation20_spill]] %s1388_s23  ;;  %s1021_s26 = sadd.s32 4294967294, %s1392_s24  }
  0x11   : > { %2405 = sst [smem:[#allocation21_spill]] %s1392_s24  ;;  %s1457_s27 = sadd.s32 1, %s1392_s24  }
  0x12   : > { %2406 = sst [smem:[#allocation22_spill]] %s1457_s27  ;;  %s38_s28 = sadd.s32 1, %s1388_s23 }
  0x13   : > { %s35_s29 = ssub.s32 %s1392_s24, %s1457_s27  ;;  %p45_p0 = scmp.ne.s32.totalorder %s1388_s23, %s1384_s22 }
  0x14   : > { %p36_p1 = scmp.eq.s32.totalorder %s35_s29, 0  ;;  %p46_p2 = scmp.eq.s32.totalorder %s1392_s24, 0 }
  0x15   : > { %p51_p3 = scmp.ne.s32.totalorder %s1384_s22, %s1380_s21  ;;  %p52_p4 = scmp.eq.s32.totalorder %s1453_s25, 0 }
  0x16   : > { %s1469_s30 = scalar_select %p36_p1, %s1388_s23, %s38_s28  }
  0x17   : > { %p47_p5 = por %p46_p2, %p45_p0  ;;  %p1471_p6 = por %p52_p4, %p51_p3 }
  0x18   : > { %2407 = sst [smem:[#allocation23_spill]] %s1469_s30  ;;  %p205_p7 = scmp.eq.s32.totalorder %s1453_s25, 1 }
  0x19   : > { %p211_p8 = scmp.eq.s32.totalorder %s1021_s26, 1  ;;  %p1023_p9 = scmp.ge.s32.totalorder %s1392_s24, 2 }
  0x1a   : > { %p1097_p10 = scmp.lt.s32.totalorder %s1392_s24, 2  ;;  %p1478_p11 = por %p205_p7, %p45_p0 }
  0x1b   : > { %p1482_p12 = por %p211_p8, %p51_p3  ;;  %s1487_s10 = sand.u32 1, %s1388_s23  }
  0x1c   : > { %s2409_s8 = scalar_select %p1478_p11, 1, 0 }
  0x1d   : > { %s2411_s9 = scalar_select %p1482_p12, 1, 0 }
  0x1e   : > { %2410 = sst [smem:[#allocation24_spill]] %s2409_s8  ;;  %s1490_s11 = sshll.u32 %s1392_s24, 4 }
  0x1f   : > { %2412 = sst [smem:[#allocation25_spill]] %s2411_s9  ;;  %s1493_s12 = sshll.u32 %s1487_s10, 6 }
  0x20   : > { %p1495_p13 = pnand %p1097_p10, %p47_p5  ;;  %s2310_s14 = sand.u32 1, %s1392_s24  }
  0x21   : > { %s2414_s1 = sld [smem:[#allocation67_spill]]  ;;  %s257_s19 = scalar_lea.vmem [#allocation5], %s1493_s12 }
  0x22   : > { %s265_s20 = sshll.u32 %s257_s19, 4  ;;  %s1507_s26 = scalar_lea.sflag [#allocation6], %s2310_s14  ;;  %s266_s20 = int_to_ptr.vmem [resolvable:$true] %s265_s20 }
  0x23   : > { %p1511_p1 = pneg %p1495_p13 }
  0x27   : > { %s262_s17 = scalar_lea.hbm %s2414_s1, %s1490_s11 }
  0x28   : > { %s263_s18 = sshll.u32 %s262_s17, 4  ;;  %s1141_s17 = scalar_lea.hbm %s2414_s1, 128  ;;  %s264_s18 = int_to_ptr.hbm [resolvable:$true] %s263_s18 }
  0x29   : > { %s1134_s28 = sshra.s32 %s264_s18, 4  ;;  %s1135_s28 = int_to_ptr.hbm [resolvable:$true] %s1134_s28 }
  0x2a   : > { %s1136_s29 = scalar_lea.hbm %s1135_s28, 64  ;;  %p1142_p4 = scmp.lt.s32.totalorder %s1135_s28, %s2414_s1 }
  0x2b   : > { %p1137_p0 = scmp.ne.s32.totalorder %s1135_s28, %s1136_s29  ;;  %p1143_p5 = scmp.lt.s32.totalorder %s1141_s17, %s1136_s29 }
  0x2d   : > { %p1139_p2 = pnand %p1511_p1, %p1137_p0  ;;  %p1144_p7 = por %p1143_p5, %p1142_p4 }
  0x2f   : > { %p1140_p3 = pneg %p1139_p2 }
  0x31   : > { %p1145_p8 = pnand %p1144_p7, %p1140_p3 }
  0x33   : > { %1148 = shalt.err (!%p1145_p8)
}
  0x34   : > { %s2318_s23 = smov 512   ;;  %s1395_s27 = smov 256  }
  0x35   : > { %s1396_s9 = smov 16   ;;  %p1042_p10 = scmp.ge.s32.totalorder %s1392_s24, 1 }
  0x36   : > { %1080 = dma.hbm_to_vmem [thread:$0]  (!%p1495_p13), %s264_s18, 1024, %s266_s20, %s1507_s26, %s2318_s23, %s1395_s27, %s1396_s9  }
  0x37   : > { %p361_p0 = scmp.lt.s32.totalorder %s1392_s24, 3  ;;  %s2417_s3 = sld [smem:[#allocation68_spill]] }
  0x38   : > { %s301_s17 = scalar_lea.vmem [#allocation8], %s1493_s12  ;;  %s2418_s1 = sand.u32 1, %s1392_s24  }
  0x39   : > { %p1531_p2 = pnand %p1042_p10, %p361_p0  ;;  %s309_s19 = sshll.u32 %s301_s17, 4  ;;  %s310_s19 = int_to_ptr.vmem [resolvable:$true] %s309_s19 }
  0x3a   : > { %s1542_s21 = scalar_lea.sflag [#allocation9], %s2418_s1 }
  0x3d   : > { %s306_s15 = scalar_lea.hbm %s2417_s3, %s1490_s11  ;;  %s1171_s28 = scalar_lea.hbm %s2417_s3, 128 }
  0x3e   : > { %s307_s16 = sshll.u32 %s306_s15, 4  ;;  %s308_s16 = int_to_ptr.hbm [resolvable:$true] %s307_s16 }
  0x3f   : > { %s1164_s8 = sshra.s32 %s308_s16, 4  ;;  %s1165_s8 = int_to_ptr.hbm [resolvable:$true] %s1164_s8 }
  0x40   : > { %s1166_s18 = scalar_lea.hbm %s1165_s8, 64  ;;  %p1172_p7 = scmp.lt.s32.totalorder %s1165_s8, %s2417_s3 }
  0x41   : > { %p1167_p3 = scmp.ne.s32.totalorder %s1165_s8, %s1166_s18  ;;  %p1173_p8 = scmp.lt.s32.totalorder %s1171_s28, %s1166_s18 }
  0x43   : > { %p1169_p4 = pnand %p1167_p3, %p1511_p1  ;;  %p1174_p10 = por %p1173_p8, %p1172_p7 }
  0x45   : > { %p1170_p5 = pneg %p1169_p4 }
  0x47   : > { %p1175_p0 = pnand %p1174_p10, %p1170_p5 }
  0x49   : > { %1178 = shalt.err (!%p1175_p0)
}
  0x4a   : > { %s2419_s1 = smov 512   ;;  %s240_s20 = scalar_lea.hbm %s2303_s0, %s1490_s11 }
  0x4b   : > { %1086 = dma.hbm_to_vmem [thread:$0]  (!%p1495_p13), %s308_s16, 1024, %s310_s19, %s1542_s21, %s2419_s1, %s1395_s27, %s1396_s9  }
  0x4c   : > { %s235_s8 = scalar_lea.vmem [#allocation2], %s1493_s12  ;;  %s241_s28 = sshll.u32 %s240_s20, 4  ;;  %s242_s28 = int_to_ptr.hbm [resolvable:$true] %s241_s28 }
  0x4d   : > { %s243_s18 = sshll.u32 %s235_s8, 4  ;;  %s232_s29 = scalar_lea.sflag [#allocation3], %s1487_s10  ;;  %s244_s18 = int_to_ptr.vmem [resolvable:$true] %s243_s18 }
  0x4e   : > { %s1194_s15 = sshra.s32 %s242_s28, 4  ;;  %s1201_s16 = scalar_lea.hbm %s2303_s0, 128  ;;  %s1195_s15 = int_to_ptr.hbm [resolvable:$true] %s1194_s15 }
  0x4f   : > { %s1196_s3 = scalar_lea.hbm %s1195_s15, 64  ;;  %p1202_p7 = scmp.lt.s32.totalorder %s1195_s15, %s2303_s0 }
  0x50   : > { %p1197_p3 = scmp.ne.s32.totalorder %s1195_s15, %s1196_s3  ;;  %p1203_p8 = scmp.lt.s32.totalorder %s1201_s16, %s1196_s3 }
  0x52   : > { %p1199_p4 = pnand %p1197_p3, %p1511_p1  ;;  %p1204_p10 = por %p1203_p8, %p1202_p7 }
  0x54   : > { %p1200_p5 = pneg %p1199_p4 }
  0x56   : > { %p1205_p0 = pnand %p1204_p10, %p1200_p5 }
  0x58   : > { %1208 = shalt.err (!%p1205_p0)
}
  0x59   : > { %1077 = dma.hbm_to_vmem [thread:$0]  (!%p1495_p13), %s242_s28, 1024, %s244_s18, %s232_s29, %s2419_s1, %s1395_s27, %s1396_s9  }
  0x5a   : > { %s284_s24 = scalar_lea.hbm %s2305_s2, %s1490_s11  ;;  %s279_s20 = scalar_lea.vmem [#allocation7], %s1493_s12 }
  0x5b   : > { %s287_s8 = sshll.u32 %s279_s20, 4  ;;  %s285_s15 = sshll.u32 %s284_s24, 4  ;;  %s288_s8 = int_to_ptr.vmem [resolvable:$true] %s287_s8  ;;  %s286_s15 = int_to_ptr.hbm [resolvable:$true] %s285_s15 }
  0x5c   : > { %s1224_s3 = sshra.s32 %s286_s15, 4  ;;  %s1231_s18 = scalar_lea.hbm %s2305_s2, 128  ;;  %s1225_s3 = int_to_ptr.hbm [resolvable:$true] %s1224_s3 }
  0x5d   : > { %s1226_s16 = scalar_lea.hbm %s1225_s3, 64  ;;  %p1232_p7 = scmp.lt.s32.totalorder %s1225_s3, %s2305_s2 }
  0x5e   : > { %p1227_p3 = scmp.ne.s32.totalorder %s1225_s3, %s1226_s16  ;;  %p1233_p8 = scmp.lt.s32.totalorder %s1231_s18, %s1226_s16 }
  0x60   : > { %p1229_p4 = pnand %p1227_p3, %p1511_p1  ;;  %p1234_p10 = por %p1233_p8, %p1232_p7 }
  0x62   : > { %p1230_p5 = pneg %p1229_p4 }
  0x64   : > { %p1235_p0 = pnand %p1234_p10, %p1230_p5 }
  0x66   : > { %1238 = shalt.err (!%p1235_p0)
}
  0x67   : > { %1083 = dma.hbm_to_vmem [thread:$0]  (!%p1495_p13), %s286_s15, 1024, %s288_s8, %s1507_s26, %s2419_s1, %s1395_s27, %s1396_s9  }
  0x68   : > { %s328_s24 = scalar_lea.hbm %s2307_s4, %s1490_s11  ;;  %s323_s20 = scalar_lea.vmem [#allocation10], %s1493_s12 }
  0x69   : > { %s331_s3 = sshll.u32 %s323_s20, 4  ;;  %s329_s16 = sshll.u32 %s328_s24, 4  ;;  %s332_s3 = int_to_ptr.vmem [resolvable:$true] %s331_s3  ;;  %s330_s16 = int_to_ptr.hbm [resolvable:$true] %s329_s16 }
  0x6a   : > { %s1254_s19 = sshra.s32 %s330_s16, 4  ;;  %s1261_s26 = scalar_lea.hbm %s2307_s4, 128  ;;  %s1255_s19 = int_to_ptr.hbm [resolvable:$true] %s1254_s19 }
  0x6b   : > { %s1256_s23 = scalar_lea.hbm %s1255_s19, 64  ;;  %p1262_p7 = scmp.lt.s32.totalorder %s1255_s19, %s2307_s4 }
  0x6c   : > { %p1257_p3 = scmp.ne.s32.totalorder %s1255_s19, %s1256_s23  ;;  %p1263_p8 = scmp.lt.s32.totalorder %s1261_s26, %s1256_s23 }
  0x6e   : > { %p1259_p4 = pnand %p1257_p3, %p1511_p1  ;;  %p1264_p10 = por %p1263_p8, %p1262_p7 }
  0x70   : > { %p1260_p5 = pneg %p1259_p4 }
  0x72   : > { %p1265_p0 = pnand %p1264_p10, %p1260_p5 }
  0x74   : > { %1268 = shalt.err (!%p1265_p0)
}
  0x75   : > { %1089 = dma.hbm_to_vmem [thread:$0]  (!%p1495_p13), %s330_s16, 1024, %s332_s3, %s1542_s21, %s2419_s1, %s1395_s27, %s1396_s9  }
  0x76   : > { %s350_s6 = scalar_lea.hbm %s2308_s5, %s1490_s11  ;;  %s345_s20 = scalar_lea.vmem [#allocation11], %s1493_s12 }
  0x77   : > { %s351_s24 = sshll.u32 %s350_s6, 4  ;;  %s353_s19 = sshll.u32 %s345_s20, 4  ;;  %s352_s24 = int_to_ptr.hbm [resolvable:$true] %s351_s24  ;;  %s354_s19 = int_to_ptr.vmem [resolvable:$true] %s353_s19 }
  0x78   : > { %s342_s23 = scalar_lea.sflag [#allocation12], %s1487_s10  ;;  %s1284_s18 = sshra.s32 %s352_s24, 4  ;;  %s1285_s18 = int_to_ptr.hbm [resolvable:$true] %s1284_s18 }
  0x79   : > { %s1286_s28 = scalar_lea.hbm %s1285_s18, 64  ;;  %s1291_s21 = scalar_lea.hbm %s2308_s5, 128 }
  0x7a   : > { %p1287_p3 = scmp.ne.s32.totalorder %s1285_s18, %s1286_s28  ;;  %p1292_p7 = scmp.lt.s32.totalorder %s1285_s18, %s2308_s5 }
  0x7b   : > { %p1293_p8 = scmp.lt.s32.totalorder %s1291_s21, %s1286_s28 }
  0x7c   : > { %p1289_p4 = pnand %p1287_p3, %p1511_p1 }
  0x7d   : > { %p1294_p10 = por %p1293_p8, %p1292_p7 }
  0x7e   : > { %p1290_p5 = pneg %p1289_p4 }
  0x80   : > { %p1295_p0 = pnand %p1294_p10, %p1290_p5 }
  0x82   : > { %1298 = shalt.err (!%p1295_p0)
}
  0x83   : > { %1092 = dma.hbm_to_vmem [thread:$0]  (!%p1495_p13), %s352_s24, 1024, %s354_s19, %s342_s23, %s2419_s1, %s1395_s27, %s1396_s9  }
  0x84   : > { %365 = sbr.rel (%p1531_p2) target bundleno = 266 (0x10a), region = 44 }
  0x89   : > { %s1637_s30 = sand.u32 1, %s1384_s22  }
  0x8a   : > { %s1043_s10 = sshll.u32 %s1637_s30, 6  ;;  %s368_s11 = scalar_lea.sflag [#allocation3], %s1637_s30 }
  0x8b   : > { %s371_s12 = scalar_lea.vmem [#allocation2], %s1043_s10 }
  0x8c   : > { %1359 = dma.done.wait (%p1471_p6), %s368_s11, 1024  }
  0x8d   : > { %1361 = vsyncadd (%p1471_p6), %s368_s11, 4294966272  ;;  %s377_s27 = sand.u32 1, %s1453_s25   ;;  %s1646_s13 = scalar_lea.vmem [#allocation5], %s1043_s10 }
  0x8e   : > { %s378_s9 = scalar_lea.sflag [#allocation6], %s377_s27 }
  0x8f   : > { %1363 = dma.done.wait (%p1471_p6), %s378_s9, 2048  }
  0x90   : > { %1365 = vsyncadd (%p1471_p6), %s378_s9, 4294965248  ;;  %s1652_s14 = scalar_lea.vmem [#allocation7], %s1043_s10  ;;  %s398_s1 = scalar_lea.sflag [#allocation9], %s377_s27 }
  0x91   : > { %s1654_s15 = scalar_lea.vmem [#allocation8], %s1043_s10 }
  0x92   : > { %1367 = dma.done.wait (%p1471_p6), %s398_s1, 2048  }
  0x93   : > { %1369 = vsyncadd (%p1471_p6), %s398_s1, 4294965248  ;;  %s1660_s29 = scalar_lea.vmem [#allocation10], %s1043_s10  ;;  %s418_s17 = scalar_lea.sflag [#allocation12], %s1637_s30 }
  0x94   : > { %s1663_s6 = scalar_lea.vmem [#allocation11], %s1043_s10 }
  0x95   : > { %1371 = dma.done.wait (%p1471_p6), %s418_s17, 1024  }
  0x96   : > { %1373 = vsyncadd (%p1471_p6), %s418_s17, 4294966272  ;;  %v1669_v0 = vld [vmem:[%s371_s12] sm:$0xff]  ;;  %v1671_v1 = vld [vmem:[%s371_s12 + $0x8] sm:$0xff]  ;;  %s1049_s7 = sshll.u32 %s1637_s30, 2  ;;  %s1051_s24 = sshll.u32 %s1453_s25, 2  ;;  %vm814_vm0 = vcmask 1040384  }
  0x97   : > { %v1673_v2 = vld [vmem:[%s371_s12 + $0x10] sm:$0xff]  ;;  %v1675_v3 = vld [vmem:[%s371_s12 + $0x18] sm:$0xff]  ;;  %v1677_v4 = vld [vmem:[%s371_s12 + $0x20] sm:$0xff]  ;;  %v2323_v6 = vunpack.c.l.bf16 %v1669_v0  ;;  %v2325_v7 = vunpack.c.h.bf16 %v1669_v0  ;;  %v2327_v8 = vunpack.c.l.bf16 %v1671_v1  ;;  %v2456_v32 = vunpack.c.h.bf16 %v1671_v1  ;;  %s2656_s23 = sld [smem:[#allocation69_spill]]  ;;  %s475_s25 = scalar_lea.vmem [#allocation13], %s1049_s7 }
  0x98   : > { %2420 = vst [vmem:[#allocation26_spill] sm:$0xff] %v1673_v2  ;;  %v1679_v5 = vld [vmem:[%s371_s12 + $0x28] sm:$0xff]  ;;  %v1685_v10 = vld [vmem:[%s371_s12 + $0x30] sm:$0xff]  ;;  %v1687_v11 = vld [vmem:[%s371_s12 + $0x38] sm:$0xff]  ;;  %v2458_v13 = vunpack.c.l.bf16 %v1673_v2  ;;  %vm816_vm1 = vcmask 1042434   ;;  %s839_s26 = sshll.u32 %s475_s25, 4  ;;  %s840_s26 = int_to_ptr.vmem [resolvable:$true] %s839_s26 }
  0x99   : > { %2421 = vst [vmem:[#allocation27_spill] sm:$0xff] %v1675_v3  ;;  %v1694_v16 = vld [vmem:[%s1646_s13] sm:$0xff]  ;;  %v1701_v21 = vld [vmem:[%s1646_s13 + $0x8] sm:$0xff]  ;;  %v1704_v22 = vld [vmem:[%s1646_s13 + $0x10] sm:$0xff]  ;;  %vm818_vm2 = vcmask 1041408   ;;  %s827_s3 = scalar_lea.sflag [#allocation4], %s1637_s30 }
  0x9a   : > { %2422 = vst [vmem:[#allocation28_spill] sm:$0xff] %v1677_v4  ;;  %v1707_v23 = vld [vmem:[%s1646_s13 + $0x18] sm:$0xff]  ;;  %v1714_v28 = vld [vmem:[%s1646_s13 + $0x20] sm:$0xff]  ;;  %v1717_v29 = vld [vmem:[%s1646_s13 + $0x28] sm:$0xff] }
  0x9b   : > { %2423 = vst [vmem:[#allocation29_spill] sm:$0xff] %v1679_v5  ;;  %v1720_v30 = vld [vmem:[%s1646_s13 + $0x30] sm:$0xff]  ;;  %v1723_v31 = vld [vmem:[%s1646_s13 + $0x38] sm:$0xff]  ;;  %v1734_v40 = vld [vmem:[%s1652_s14] sm:$0xff] }
  0x9c   : > { %2424 = vst [vmem:[#allocation30_spill] sm:$0xff] %v1685_v10  ;;  %v1737_v41 = vld [vmem:[%s1652_s14 + $0x8] sm:$0xff]  ;;  %v1744_v46 = vld [vmem:[%s1652_s14 + $0x10] sm:$0xff]  ;;  %v1747_v47 = vld [vmem:[%s1652_s14 + $0x18] sm:$0xff] }
  0x9d   : > { %2425 = vst [vmem:[#allocation31_spill] sm:$0xff] %v1687_v11  ;;  %v1754_v52 = vld [vmem:[%s1652_s14 + $0x20] sm:$0xff]  ;;  %v1757_v53 = vld [vmem:[%s1652_s14 + $0x28] sm:$0xff]  ;;  %v1760_v54 = vld [vmem:[%s1652_s14 + $0x30] sm:$0xff]  ;;  %s2657_s18 = smov %s2656_s23  ;;  %s837_s28 = scalar_lea.hbm %s2656_s23, %s1051_s24 }
  0x9e   : > { %2426 = vst [vmem:[#allocation32_spill] sm:$0xff] %v1694_v16  ;;  %v1763_v55 = vld [vmem:[%s1652_s14 + $0x38] sm:$0xff]  ;;  %v1774_v51 = vld [vmem:[%s1654_s15] sm:$0xff]  ;;  %v1777_v56 = vld [vmem:[%s1654_s15 + $0x8] sm:$0xff]  ;;  %s841_s8 = sshll.u32 %s837_s28, 4  ;;  %s1334_s27 = scalar_lea.hbm %s2657_s18, 8  ;;  %s842_s8 = int_to_ptr.hbm [resolvable:$true] %s841_s8 }
  0x9f   : > { %2427 = vst [vmem:[#allocation33_spill] sm:$0xff] %v1701_v21  ;;  %v1784_v61 = vld [vmem:[%s1654_s15 + $0x10] sm:$0xff]  ;;  %v1787_v50 = vld [vmem:[%s1654_s15 + $0x18] sm:$0xff]  ;;  %v1794_v48 = vld [vmem:[%s1654_s15 + $0x20] sm:$0xff]  ;;  %s1328_s16 = sshra.s32 %s842_s8, 4  ;;  %s1329_s16 = int_to_ptr.hbm [resolvable:$true] %s1328_s16 }
  0xa0   : > { %2428 = vst [vmem:[#allocation34_spill] sm:$0xff] %v1704_v22  ;;  %v1797_v59 = vld [vmem:[%s1654_s15 + $0x28] sm:$0xff]  ;;  %v1800_v60 = vld [vmem:[%s1654_s15 + $0x30] sm:$0xff]  ;;  %v1803_v57 = vld [vmem:[%s1654_s15 + $0x38] sm:$0xff]  ;;  %s1330_s10 = scalar_lea.hbm %s1329_s16, 4  ;;  %p1335_p2 = scmp.lt.s32.totalorder %s1329_s16, %s2657_s18 }
  0xa1   : > { %2429 = vst [vmem:[#allocation35_spill] sm:$0xff] %v1707_v23  ;;  %v1814_v39 = vld [vmem:[%s1660_s29] sm:$0xff]  ;;  %v1817_v62 = vld [vmem:[%s1660_s29 + $0x8] sm:$0xff]  ;;  %v1824_v44 = vld [vmem:[%s1660_s29 + $0x10] sm:$0xff]  ;;  %p1331_p6 = scmp.ne.s32.totalorder %s1329_s16, %s1330_s10  ;;  %p1336_p3 = scmp.lt.s32.totalorder %s1334_s27, %s1330_s10 }
  0xa2   : > { %2430 = vst [vmem:[#allocation36_spill] sm:$0xff] %v1714_v28  ;;  %v1827_v38 = vld [vmem:[%s1660_s29 + $0x18] sm:$0xff]  ;;  %v1834_v36 = vld [vmem:[%s1660_s29 + $0x20] sm:$0xff]  ;;  %v1837_v49 = vld [vmem:[%s1660_s29 + $0x28] sm:$0xff]  ;;  %v2322_v43 = vunpack.c.l.bf16 %v1814_v39  ;;  %v2324_v35 = vunpack.c.h.bf16 %v1814_v39  ;;  %v2326_v42 = vunpack.c.l.bf16 %v1817_v62  ;;  %v2457_v33 = vunpack.c.h.bf16 %v1817_v62 }
  0xa3   : > { %2431 = vst [vmem:[#allocation37_spill] sm:$0xff] %v1717_v29  ;;  %v1840_v58 = vld [vmem:[%s1660_s29 + $0x30] sm:$0xff]  ;;  %v1843_v45 = vld [vmem:[%s1660_s29 + $0x38] sm:$0xff]  ;;  %v1854_v27 = vld [vmem:[%s1663_s6] sm:$0xff]  ;;  %v2459_v9 = vunpack.c.l.bf16 %v1824_v44  ;;  %v2461_v37 = vunpack.c.h.bf16 %v1824_v44  ;;  %v2463_v63 = vunpack.c.l.bf16 %v1827_v38  ;;  %p1332_p13 = pnand %p1331_p6, %p1478_p11  ;;  %p1337_p4 = por %p1336_p3, %p1335_p2 }
  0xa4   : > { %2432 = vst [vmem:[#allocation38_spill] sm:$0xff] %v1720_v30  ;;  %v1857_v26 = vld [vmem:[%s1663_s6 + $0x8] sm:$0xff]  ;;  %v1864_v18 = vld [vmem:[%s1663_s6 + $0x10] sm:$0xff]  ;;  %v1867_v17 = vld [vmem:[%s1663_s6 + $0x18] sm:$0xff]  ;;  %v627_v12 = vmul.f32 %v2322_v43, %v2323_v6  ;;  %v628_v19 = vmul.f32 %v2324_v35, %v2325_v7  ;;  %v629_v15 = vmul.f32 %v2326_v42, %v2327_v8  ;;  %v630_v14 = vmul.f32 %v2457_v33, %v2456_v32 }
  0xa5   : > { %2433 = vst [vmem:[#allocation39_spill] sm:$0xff] %v1723_v31  ;;  %v1874_v34 = vld [vmem:[%s1663_s6 + $0x20] sm:$0xff]  ;;  %v1877_v25 = vld [vmem:[%s1663_s6 + $0x28] sm:$0xff]  ;;  %v1880_v24 = vld [vmem:[%s1663_s6 + $0x30] sm:$0xff]  ;;  %v631_v43 = vmul.f32 %v2459_v9, %v2458_v13  ;;  %v2460_v6 = vunpack.c.h.bf16 %v1673_v2  ;;  %v2462_v7 = vunpack.c.l.bf16 %v1675_v3  ;;  %v2464_v8 = vunpack.c.h.bf16 %v1675_v3  ;;  %p1333_p1 = pneg %p1332_p13 }
  0xa6   : > { %2434 = vst [vmem:[#allocation40_spill] sm:$0xff] %v1774_v51  ;;  %v1883_v20 = vld [vmem:[%s1663_s6 + $0x38] sm:$0xff]  ;;  %v2466_v33 = vunpack.c.l.bf16 %v1677_v4  ;;  %v2468_v13 = vunpack.c.h.bf16 %v1677_v4  ;;  %v2479_v51 = vunpack.c.l.bf16 %v1843_v45 }
  0xa7   : > { %2435 = vst [vmem:[#allocation41_spill] sm:$0xff] %v1777_v56  ;;  %v632_v35 = vmul.f32 %v2461_v37, %v2460_v6  ;;  %v633_v42 = vmul.f32 %v2463_v63, %v2462_v7  ;;  %v2470_v37 = vunpack.c.l.bf16 %v1679_v5  ;;  %v2472_v63 = vunpack.c.h.bf16 %v1679_v5  ;;  %p1338_p5 = pnand %p1337_p4, %p1333_p1 }
  0xa8   : > { %2436 = vst [vmem:[#allocation42_spill] sm:$0xff] %v1784_v61  ;;  %v2475_v61 = vunpack.c.l.bf16 %v1840_v58  ;;  %v2477_v56 = vunpack.c.h.bf16 %v1840_v58  ;;  %v2511_v5 = vunpack.c.l.bf16 %v1883_v20 }
  0xa9   : > { %2437 = vst [vmem:[#allocation43_spill] sm:$0xff] %v1787_v50  ;;  %v2473_v50 = vunpack.c.h.bf16 %v1837_v49 }
  0xaa   : > { %2438 = vst [vmem:[#allocation44_spill] sm:$0xff] %v1794_v48  ;;  %v2471_v48 = vunpack.c.l.bf16 %v1837_v49 }
  0xab   : > { %2439 = vst [vmem:[#allocation45_spill] sm:$0xff] %v1797_v59  ;;  %v2469_v59 = vunpack.c.h.bf16 %v1834_v36 }
  0xac   : > { %2440 = vst [vmem:[#allocation46_spill] sm:$0xff] %v1800_v60  ;;  %v2467_v60 = vunpack.c.l.bf16 %v1834_v36  ;;  %v637_v7 = vmul.f32 %v2471_v48, %v2470_v37  ;;  %v2480_v37 = vunpack.c.h.bf16 %v1687_v11 }
  0xad   : > { %2441 = vst [vmem:[#allocation47_spill] sm:$0xff] %v1803_v57  ;;  %v2465_v57 = vunpack.c.h.bf16 %v1827_v38  ;;  %v636_v6 = vmul.f32 %v2469_v59, %v2468_v13  ;;  %v2478_v13 = vunpack.c.l.bf16 %v1687_v11  ;;  %v2503_v11 = vunpack.c.l.bf16 %v1877_v25 }
  0xae   : > { %2442 = vst [vmem:[#allocation48_spill] sm:$0xff] %v1814_v39  ;;  %v635_v9 = vmul.f32 %v2467_v60, %v2466_v33  ;;  %v2476_v33 = vunpack.c.h.bf16 %v1685_v10  ;;  %v2495_v39 = vunpack.c.l.bf16 %v1867_v17 }
  0xaf   : > { %2443 = vst [vmem:[#allocation49_spill] sm:$0xff] %v1817_v62  ;;  %v634_v32 = vmul.f32 %v2465_v57, %v2464_v8  ;;  %v638_v8 = vmul.f32 %v2473_v50, %v2472_v63  ;;  %v2474_v57 = vunpack.c.l.bf16 %v1685_v10  ;;  %v641_v48 = vmul.f32 %v2479_v51, %v2478_v13 }
  0xb0   : > { %2444 = vst [vmem:[#allocation50_spill] sm:$0xff] %v1824_v44  ;;  %v640_v59 = vmul.f32 %v2477_v56, %v2476_v33  ;;  %v2482_v63 = vunpack.c.l.bf16 %v1694_v16  ;;  %v2486_v33 = vunpack.c.l.bf16 %v1701_v21  ;;  %v2488_v13 = vunpack.c.h.bf16 %v1701_v21 }
  0xb1   : > { %2445 = vst [vmem:[#allocation51_spill] sm:$0xff] %v1827_v38  ;;  %v639_v60 = vmul.f32 %v2475_v61, %v2474_v57  ;;  %v2484_v57 = vunpack.c.h.bf16 %v1694_v16  ;;  %v2487_v38 = vunpack.c.l.bf16 %v1857_v26  ;;  %v2491_v44 = vunpack.c.l.bf16 %v1864_v18 }
  0xb2   : > { %2446 = vst [vmem:[#allocation52_spill] sm:$0xff] %v1834_v36  ;;  %v2483_v36 = vunpack.c.l.bf16 %v1854_v27  ;;  %v2493_v62 = vunpack.c.h.bf16 %v1864_v18  ;;  %v2497_v21 = vunpack.c.h.bf16 %v1867_v17  ;;  %v2499_v16 = vunpack.c.l.bf16 %v1874_v34 }
  0xb3   : > { %2447 = vst [vmem:[#allocation53_spill] sm:$0xff] %v1837_v49  ;;  %v2481_v49 = vunpack.c.h.bf16 %v1843_v45  ;;  %v645_v51 = vmul.f32 %v2487_v38, %v2486_v33  ;;  %v2496_v33 = vunpack.c.h.bf16 %v1707_v23  ;;  %v2507_v10 = vunpack.c.l.bf16 %v1880_v24 }
  0xb4   : > { %2448 = vst [vmem:[#allocation54_spill] sm:$0xff] %v1840_v58  ;;  %v643_v61 = vmul.f32 %v2483_v36, %v2482_v63  ;;  %v2485_v58 = vunpack.c.h.bf16 %v1854_v27  ;;  %v2492_v63 = vunpack.c.h.bf16 %v1704_v22 }
  0xb5   : > { %2449 = vst [vmem:[#allocation55_spill] sm:$0xff] %v1843_v45  ;;  %v642_v50 = vmul.f32 %v2481_v49, %v2480_v37  ;;  %v2489_v45 = vunpack.c.h.bf16 %v1857_v26  ;;  %v2490_v37 = vunpack.c.l.bf16 %v1704_v22  ;;  %v2501_v22 = vunpack.c.h.bf16 %v1874_v34 }
  0xb6   : > { %2450 = vst [vmem:[#allocation56_spill] sm:$0xff] %v1864_v18  ;;  %v644_v56 = vmul.f32 %v2485_v58, %v2484_v57  ;;  %v648_v58 = vmul.f32 %v2493_v62, %v2492_v63  ;;  %v2494_v57 = vunpack.c.l.bf16 %v1707_v23  ;;  %v2502_v63 = vunpack.c.l.bf16 %v1717_v29 }
  0xb7   : > { %2451 = vst [vmem:[#allocation57_spill] sm:$0xff] %v1867_v17  ;;  %v646_v49 = vmul.f32 %v2489_v45, %v2488_v13  ;;  %v647_v36 = vmul.f32 %v2491_v44, %v2490_v37  ;;  %v650_v45 = vmul.f32 %v2497_v21, %v2496_v33  ;;  %v2498_v13 = vunpack.c.l.bf16 %v1714_v28 }
  0xb8   : > { %2452 = vst [vmem:[#allocation58_spill] sm:$0xff] %v1874_v34  ;;  %v649_v38 = vmul.f32 %v2495_v39, %v2494_v57  ;;  %v2500_v37 = vunpack.c.h.bf16 %v1714_v28  ;;  %v653_v39 = vmul.f32 %v2503_v11, %v2502_v63  ;;  %v2504_v57 = vunpack.c.h.bf16 %v1717_v29 }
  0xb9   : > { %2453 = vst [vmem:[#allocation59_spill] sm:$0xff] %v1877_v25  ;;  %v651_v44 = vmul.f32 %v2499_v16, %v2498_v13  ;;  %v2505_v23 = vunpack.c.h.bf16 %v1877_v25  ;;  %v2506_v33 = vunpack.c.l.bf16 %v1720_v30  ;;  %v2508_v13 = vunpack.c.h.bf16 %v1720_v30 }
  0xba   : > { %2454 = vst [vmem:[#allocation60_spill] sm:$0xff] %v1880_v24  ;;  %v652_v62 = vmul.f32 %v2501_v22, %v2500_v37  ;;  %v2509_v28 = vunpack.c.h.bf16 %v1880_v24  ;;  %v2510_v37 = vunpack.c.l.bf16 %v1723_v31  ;;  %v2512_v63 = vunpack.c.h.bf16 %v1723_v31 }
  0xbb   : > { %2455 = vst [vmem:[#allocation61_spill] sm:$0xff] %v1883_v20  ;;  %v654_v21 = vmul.f32 %v2505_v23, %v2504_v57  ;;  %v655_v16 = vmul.f32 %v2507_v10, %v2506_v33  ;;  %v2513_v29 = vunpack.c.h.bf16 %v1883_v20  ;;  %v659_v57 = vadd.f32 %v643_v61, %v627_v12 }
  0xbc   : > { %v656_v22 = vmul.f32 %v2509_v28, %v2508_v13  ;;  %v657_v11 = vmul.f32 %v2511_v5, %v2510_v37  ;;  %v660_v25 = vadd.f32 %v644_v56, %v628_v19  ;;  %v661_v34 = vadd.f32 %v645_v51, %v629_v15 }
  0xbd   : > { %v658_v23 = vmul.f32 %v2513_v29, %v2512_v63  ;;  %v662_v4 = vadd.f32 %v646_v49, %v630_v14  ;;  %v663_v10 = vadd.f32 %v647_v36, %v631_v43  ;;  %v664_v33 = vadd.f32 %v648_v58, %v632_v35 }
  0xbe   : > { %v665_v30 = vadd.f32 %v649_v38, %v633_v42  ;;  %v666_v17 = vadd.f32 %v650_v45, %v634_v32  ;;  %v667_v24 = vadd.f32 %v651_v44, %v635_v9  ;;  %v668_v28 = vadd.f32 %v652_v62, %v636_v6  ;;  %v2543_v45 = vld [vmem:[#allocation26_spill] sm:$0xff]  ;;  %v2545_v62 = vld [vmem:[#allocation56_spill] sm:$0xff]  ;;  %v2551_v63 = vld [vmem:[#allocation57_spill] sm:$0xff] }
  0xbf   : > { %v669_v13 = vadd.f32 %v653_v39, %v637_v7  ;;  %v670_v3 = vadd.f32 %v654_v21, %v638_v8  ;;  %v671_v18 = vadd.f32 %v655_v16, %v639_v60  ;;  %v672_v2 = vadd.f32 %v656_v22, %v640_v59  ;;  %v2549_v22 = vld [vmem:[#allocation27_spill] sm:$0xff] }
  0xc0   : > { %v673_v5 = vadd.f32 %v657_v11, %v641_v48  ;;  %v674_v37 = vadd.f32 %v658_v23, %v642_v50  ;;  %v2514_v31 = vunpack.c.l.bf16 %v1734_v40  ;;  %v2515_v12 = vunpack.c.h.bf16 %v1734_v40 }
  0xc1   : > { %v2516_v14 = vunpack.c.l.bf16 %v1737_v41  ;;  %v2517_v29 = vunpack.c.h.bf16 %v1737_v41  ;;  %v2518_v42 = vunpack.c.l.bf16 %v1744_v46  ;;  %v2519_v32 = vunpack.c.h.bf16 %v1744_v46 }
  0xc2   : > { %v2031_v20 = vmul.f32 %v659_v57, %v2514_v31  ;;  %v2035_v15 = vmul.f32 %v660_v25, %v2515_v12  ;;  %v2520_v40 = vunpack.c.l.bf16 %v1747_v47  ;;  %v2521_v9 = vunpack.c.h.bf16 %v1747_v47 }
  0xc3   : > { %v2039_v19 = vmul.f32 %v661_v34, %v2516_v14  ;;  %v2043_v35 = vmul.f32 %v662_v4, %v2517_v29  ;;  %v2047_v43 = vmul.f32 %v663_v10, %v2518_v42  ;;  %v2051_v31 = vmul.f32 %v664_v33, %v2519_v32  ;;  %v2555_v33 = vld [vmem:[#allocation28_spill] sm:$0xff]  ;;  %v2561_v42 = vld [vmem:[#allocation29_spill] sm:$0xff] }
  0xc4   : > { %v2055_v25 = vmul.f32 %v665_v30, %v2520_v40  ;;  %v2059_v34 = vmul.f32 %v666_v17, %v2521_v9  ;;  %v2522_v41 = vunpack.c.l.bf16 %v1754_v52  ;;  %v2523_v6 = vunpack.c.h.bf16 %v1754_v52  ;;  %v2563_v40 = vld [vmem:[#allocation59_spill] sm:$0xff] }
  0xc5   : > { %v2524_v46 = vunpack.c.l.bf16 %v1757_v53  ;;  %v2525_v60 = vunpack.c.h.bf16 %v1757_v53  ;;  %v2527_v47 = vunpack.c.l.bf16 %v1760_v54  ;;  %v2529_v59 = vunpack.c.h.bf16 %v1760_v54 }
  0xc6   : > { %v2063_v4 = vmul.f32 %v667_v24, %v2522_v41  ;;  %v2067_v7 = vmul.f32 %v668_v28, %v2523_v6  ;;  %v2531_v52 = vunpack.c.l.bf16 %v1763_v55  ;;  %v2533_v50 = vunpack.c.h.bf16 %v1763_v55 }
  0xc7   : > { %v2071_v8 = vmul.f32 %v669_v13, %v2524_v46  ;;  %v2075_v30 = vmul.f32 %v670_v3, %v2525_v60  ;;  %v2079_v17 = vmul.f32 %v671_v18, %v2527_v47  ;;  %v2083_v24 = vmul.f32 %v672_v2, %v2529_v59  ;;  %v2557_v13 = vld [vmem:[#allocation58_spill] sm:$0xff] }
  0xc8   : > { %v2087_v48 = vmul.f32 %v673_v5, %v2531_v52  ;;  %v2091_v61 = vmul.f32 %v674_v37, %v2533_v50  ;;  %v2535_v53 = vunpack.c.l.bf16 %v1669_v0  ;;  %v2536_v3 = vunpack.c.l.bf16 %v1854_v27  ;;  %v2567_v47 = vld [vmem:[#allocation30_spill] sm:$0xff]  ;;  %v2569_v52 = vld [vmem:[#allocation60_spill] sm:$0xff] }
  0xc9   : > { %2526 = vst [vmem:[#allocation62_spill] sm:$0xff] %v2075_v30  ;;  %v2537_v18 = vunpack.c.h.bf16 %v1669_v0  ;;  %v2538_v51 = vunpack.c.h.bf16 %v1854_v27  ;;  %v2539_v2 = vunpack.c.l.bf16 %v1671_v1  ;;  %v2540_v49 = vunpack.c.l.bf16 %v1857_v26 }
  0xca   : > { %2528 = vst [vmem:[#allocation63_spill] sm:$0xff] %v2079_v17  ;;  %v691_v56 = vmul.f32 %v2536_v3, %v2535_v53  ;;  %v2541_v58 = vunpack.c.h.bf16 %v1671_v1  ;;  %v2542_v55 = vunpack.c.h.bf16 %v1857_v26  ;;  %v2544_v44 = vunpack.c.l.bf16 %v2543_v45 }
  0xcb   : > { %2530 = vst [vmem:[#allocation64_spill] sm:$0xff] %v2083_v24  ;;  %v692_v54 = vmul.f32 %v2538_v51, %v2537_v18  ;;  %v693_v36 = vmul.f32 %v2540_v49, %v2539_v2  ;;  %v2546_v39 = vunpack.c.l.bf16 %v2545_v62  ;;  %v2547_v0 = vunpack.c.h.bf16 %v2543_v45  ;;  %v2573_v2 = vld [vmem:[#allocation31_spill] sm:$0xff] }
  0xcc   : > { %2532 = vst [vmem:[#allocation65_spill] sm:$0xff] %v2087_v48  ;;  %v694_v38 = vmul.f32 %v2542_v55, %v2541_v58  ;;  %v2548_v27 = vunpack.c.h.bf16 %v2545_v62  ;;  %v2550_v11 = vunpack.c.l.bf16 %v2549_v22  ;;  %v2552_v23 = vunpack.c.l.bf16 %v2551_v63  ;;  %v2575_v58 = vld [vmem:[#allocation61_spill] sm:$0xff] }
  0xcd   : > { %2534 = vst [vmem:[#allocation66_spill] sm:$0xff] %v2091_v61  ;;  %v695_v21 = vmul.f32 %v2546_v39, %v2544_v44  ;;  %v2553_v1 = vunpack.c.h.bf16 %v2549_v22  ;;  %v2554_v26 = vunpack.c.h.bf16 %v2551_v63  ;;  %v2556_v28 = vunpack.c.l.bf16 %v2555_v33  ;;  %v2581_v22 = vld [vmem:[#allocation48_spill] sm:$0xff] }
  0xce   : > { %v696_v16 = vmul.f32 %v2548_v27, %v2547_v0  ;;  %v697_v57 = vmul.f32 %v2552_v23, %v2550_v11  ;;  %v2558_v5 = vunpack.c.l.bf16 %v2557_v13  ;;  %v2559_v12 = vunpack.c.h.bf16 %v2555_v33  ;;  %v2579_v0 = vld [vmem:[#allocation32_spill] sm:$0xff]  ;;  %v2585_v33 = vld [vmem:[#allocation33_spill] sm:$0xff] }
  0xcf   : > { %v698_v10 = vmul.f32 %v2554_v26, %v2553_v1  ;;  %v2560_v14 = vunpack.c.h.bf16 %v2557_v13  ;;  %v2562_v32 = vunpack.c.l.bf16 %v2561_v42  ;;  %v2564_v9 = vunpack.c.l.bf16 %v2563_v40  ;;  %v2587_v13 = vld [vmem:[#allocation49_spill] sm:$0xff] }
  0xd0   : > { %v699_v37 = vmul.f32 %v2558_v5, %v2556_v28  ;;  %v2565_v6 = vunpack.c.h.bf16 %v2561_v42  ;;  %v2566_v46 = vunpack.c.h.bf16 %v2563_v40  ;;  %v2568_v59 = vunpack.c.l.bf16 %v2567_v47  ;;  %v2591_v40 = vld [vmem:[#allocation34_spill] sm:$0xff] }
  0xd1   : > { %v700_v29 = vmul.f32 %v2560_v14, %v2559_v12  ;;  %v701_v41 = vmul.f32 %v2564_v9, %v2562_v32  ;;  %v2570_v50 = vunpack.c.l.bf16 %v2569_v52  ;;  %v2571_v3 = vunpack.c.h.bf16 %v2567_v47 }
  0xd2   : > { %v702_v60 = vmul.f32 %v2566_v46, %v2565_v6  ;;  %v2572_v18 = vunpack.c.h.bf16 %v2569_v52  ;;  %v2574_v49 = vunpack.c.l.bf16 %v2573_v2  ;;  %v2576_v55 = vunpack.c.l.bf16 %v2575_v58  ;;  %v2593_v6 = vld [vmem:[#allocation50_spill] sm:$0xff] }
  0xd3   : > { %v703_v53 = vmul.f32 %v2570_v50, %v2568_v59  ;;  %v2577_v44 = vunpack.c.h.bf16 %v2573_v2  ;;  %v2578_v62 = vunpack.c.h.bf16 %v2575_v58  ;;  %v2580_v27 = vunpack.c.l.bf16 %v2579_v0  ;;  %v2599_v2 = vld [vmem:[#allocation51_spill] sm:$0xff] }
  0xd4   : > { %v704_v51 = vmul.f32 %v2572_v18, %v2571_v3  ;;  %v705_v45 = vmul.f32 %v2576_v55, %v2574_v49  ;;  %v2582_v11 = vunpack.c.l.bf16 %v2581_v22  ;;  %v2583_v23 = vunpack.c.h.bf16 %v2579_v0  ;;  %v2597_v3 = vld [vmem:[#allocation35_spill] sm:$0xff]  ;;  %v2603_v0 = vld [vmem:[#allocation36_spill] sm:$0xff] }
  0xd5   : > { %v706_v39 = vmul.f32 %v2578_v62, %v2577_v44  ;;  %v2584_v1 = vunpack.c.h.bf16 %v2581_v22  ;;  %v2586_v28 = vunpack.c.l.bf16 %v2585_v33  ;;  %v2588_v5 = vunpack.c.l.bf16 %v2587_v13  ;;  %v2605_v22 = vld [vmem:[#allocation52_spill] sm:$0xff] }
  0xd6   : > { %v707_v63 = vmul.f32 %v2582_v11, %v2580_v27  ;;  %v2589_v14 = vunpack.c.h.bf16 %v2585_v33  ;;  %v2590_v42 = vunpack.c.h.bf16 %v2587_v13  ;;  %v2592_v9 = vunpack.c.l.bf16 %v2591_v40  ;;  %v2609_v13 = vld [vmem:[#allocation37_spill] sm:$0xff] }
  0xd7   : > { %v708_v26 = vmul.f32 %v2584_v1, %v2583_v23  ;;  %v709_v12 = vmul.f32 %v2588_v5, %v2586_v28  ;;  %v2594_v46 = vunpack.c.l.bf16 %v2593_v6  ;;  %v2595_v59 = vunpack.c.h.bf16 %v2591_v40 }
  0xd8   : > { %v710_v32 = vmul.f32 %v2590_v42, %v2589_v14  ;;  %v2596_v52 = vunpack.c.h.bf16 %v2593_v6  ;;  %v2598_v18 = vunpack.c.l.bf16 %v2597_v3  ;;  %v2600_v49 = vunpack.c.l.bf16 %v2599_v2  ;;  %v2611_v14 = vld [vmem:[#allocation53_spill] sm:$0xff] }
  0xd9   : > { %v711_v47 = vmul.f32 %v2594_v46, %v2592_v9  ;;  %v2601_v55 = vunpack.c.h.bf16 %v2597_v3  ;;  %v2602_v44 = vunpack.c.h.bf16 %v2599_v2  ;;  %v2604_v27 = vunpack.c.l.bf16 %v2603_v0  ;;  %v2617_v3 = vld [vmem:[#allocation54_spill] sm:$0xff] }
  0xda   : > { %v712_v50 = vmul.f32 %v2596_v52, %v2595_v59  ;;  %v713_v58 = vmul.f32 %v2600_v49, %v2598_v18  ;;  %v2606_v11 = vunpack.c.l.bf16 %v2605_v22  ;;  %v2607_v1 = vunpack.c.h.bf16 %v2603_v0  ;;  %v2615_v59 = vld [vmem:[#allocation38_spill] sm:$0xff]  ;;  %v2621_v0 = vld [vmem:[#allocation39_spill] sm:$0xff] }
  0xdb   : > { %v714_v62 = vmul.f32 %v2602_v44, %v2601_v55  ;;  %v2608_v33 = vunpack.c.h.bf16 %v2605_v22  ;;  %v2610_v5 = vunpack.c.l.bf16 %v2609_v13  ;;  %v2612_v42 = vunpack.c.l.bf16 %v2611_v14  ;;  %v2623_v22 = vld [vmem:[#allocation55_spill] sm:$0xff] }
  0xdc   : > { %v715_v23 = vmul.f32 %v2606_v11, %v2604_v27  ;;  %v2613_v9 = vunpack.c.h.bf16 %v2609_v13  ;;  %v2614_v6 = vunpack.c.h.bf16 %v2611_v14  ;;  %v2616_v52 = vunpack.c.l.bf16 %v2615_v59 }
  0xdd   : > { %v716_v28 = vmul.f32 %v2608_v33, %v2607_v1  ;;  %v717_v40 = vmul.f32 %v2612_v42, %v2610_v5  ;;  %v2618_v18 = vunpack.c.l.bf16 %v2617_v3  ;;  %v2619_v49 = vunpack.c.h.bf16 %v2615_v59 }
  0xde   : > { %v718_v46 = vmul.f32 %v2614_v6, %v2613_v9  ;;  %v2620_v55 = vunpack.c.h.bf16 %v2617_v3  ;;  %v2622_v27 = vunpack.c.l.bf16 %v2621_v0  ;;  %v2624_v11 = vunpack.c.l.bf16 %v2623_v22 }
  0xdf   : > { %v719_v2 = vmul.f32 %v2618_v18, %v2616_v52  ;;  %v2625_v33 = vunpack.c.h.bf16 %v2621_v0  ;;  %v2626_v13 = vunpack.c.h.bf16 %v2623_v22  ;;  %v723_v14 = vsub.f32 %v691_v56, %v707_v63  ;;  %v2627_v0 = vld [vmem:[#allocation40_spill] sm:$0xff] }
  0xe0   : > { %v720_v44 = vmul.f32 %v2620_v55, %v2619_v49  ;;  %v721_v1 = vmul.f32 %v2624_v11, %v2622_v27  ;;  %v724_v42 = vsub.f32 %v692_v54, %v708_v26  ;;  %v725_v9 = vsub.f32 %v693_v36, %v709_v12  ;;  %v2630_v36 = vld [vmem:[#allocation41_spill] sm:$0xff]  ;;  %v2639_v63 = vld [vmem:[#allocation44_spill] sm:$0xff] }
  0xe1   : > { %v722_v5 = vmul.f32 %v2626_v13, %v2625_v33  ;;  %v726_v6 = vsub.f32 %v694_v38, %v710_v32  ;;  %v727_v52 = vsub.f32 %v695_v21, %v711_v47  ;;  %v728_v18 = vsub.f32 %v696_v16, %v712_v50  ;;  %v2642_v50 = vld [vmem:[#allocation45_spill] sm:$0xff]  ;;  %v2648_v33 = vld [vmem:[#allocation47_spill] sm:$0xff] }
  0xe2   : > { %v729_v59 = vsub.f32 %v697_v57, %v713_v58  ;;  %v730_v61 = vsub.f32 %v698_v10, %v714_v62  ;;  %v731_v3 = vsub.f32 %v699_v37, %v715_v23  ;;  %v732_v49 = vsub.f32 %v700_v29, %v716_v28  ;;  %v2633_v10 = vld [vmem:[#allocation42_spill] sm:$0xff] }
  0xe3   : > { %v733_v55 = vsub.f32 %v701_v41, %v717_v40  ;;  %v734_v48 = vsub.f32 %v702_v60, %v718_v46  ;;  %v735_v24 = vsub.f32 %v703_v53, %v719_v2  ;;  %v736_v17 = vsub.f32 %v704_v51, %v720_v44  ;;  %v2636_v53 = vld [vmem:[#allocation43_spill] sm:$0xff]  ;;  %v2645_v40 = vld [vmem:[#allocation46_spill] sm:$0xff] }
  0xe4   : > { %v737_v27 = vsub.f32 %v705_v45, %v721_v1  ;;  %v738_v11 = vsub.f32 %v706_v39, %v722_v5  ;;  %v2628_v30 = vunpack.c.l.bf16 %v2627_v0  ;;  %v2629_v56 = vunpack.c.h.bf16 %v2627_v0  ;;  %v2655_v0 = vld [vmem:[#allocation66_spill] sm:$0xff] }
  0xe5   : > { %v2631_v38 = vunpack.c.l.bf16 %v2630_v36  ;;  %v2632_v16 = vunpack.c.h.bf16 %v2630_v36  ;;  %v2634_v37 = vunpack.c.l.bf16 %v2633_v10  ;;  %v2635_v41 = vunpack.c.h.bf16 %v2633_v10 }
  0xe6   : > { %v739_v22 = vmul.f32 %v723_v14, %v2628_v30  ;;  %v740_v54 = vmul.f32 %v724_v42, %v2629_v56  ;;  %v2637_v51 = vunpack.c.l.bf16 %v2636_v53  ;;  %v2638_v30 = vunpack.c.h.bf16 %v2636_v53 }
  0xe7   : > { %v741_v21 = vmul.f32 %v725_v9, %v2631_v38  ;;  %v742_v57 = vmul.f32 %v726_v6, %v2632_v16  ;;  %v743_v29 = vmul.f32 %v727_v52, %v2634_v37  ;;  %v744_v60 = vmul.f32 %v728_v18, %v2635_v41 }
  0xe8   : > { %v745_v45 = vmul.f32 %v729_v59, %v2637_v51  ;;  %v746_v39 = vmul.f32 %v730_v61, %v2638_v30  ;;  %v2640_v26 = vunpack.c.l.bf16 %v2639_v63  ;;  %v2641_v32 = vunpack.c.h.bf16 %v2639_v63 }
  0xe9   : > { %v2643_v58 = vunpack.c.l.bf16 %v2642_v50  ;;  %v2644_v23 = vunpack.c.h.bf16 %v2642_v50  ;;  %v2646_v46 = vunpack.c.l.bf16 %v2645_v40  ;;  %v2647_v44 = vunpack.c.h.bf16 %v2645_v40 }
  0xea   : > { %v747_v12 = vmul.f32 %v731_v3, %v2640_v26  ;;  %v748_v47 = vmul.f32 %v732_v49, %v2641_v32  ;;  %v2649_v61 = vunpack.c.l.bf16 %v2648_v33  ;;  %v2650_v5 = vunpack.c.h.bf16 %v2648_v33  ;;  %v2651_v49 = vld [vmem:[#allocation62_spill] sm:$0xff] }
  0xeb   : > { %v749_v62 = vmul.f32 %v733_v55, %v2643_v58  ;;  %v750_v28 = vmul.f32 %v734_v48, %v2644_v23  ;;  %v751_v2 = vmul.f32 %v735_v24, %v2646_v46  ;;  %v752_v1 = vmul.f32 %v736_v17, %v2647_v44  ;;  %v2652_v55 = vld [vmem:[#allocation63_spill] sm:$0xff] }
  0xec   : > { %v753_v13 = vmul.f32 %v737_v27, %v2649_v61  ;;  %v754_v14 = vmul.f32 %v738_v11, %v2650_v5  ;;  %v755_v42 = vadd.f32 %v739_v22, %v2031_v20  ;;  %v756_v9 = vadd.f32 %v740_v54, %v2035_v15  ;;  %v2653_v27 = vld [vmem:[#allocation64_spill] sm:$0xff]  ;;  %v2654_v11 = vld [vmem:[#allocation65_spill] sm:$0xff] }
  0xed   : > { %v757_v6 = vadd.f32 %v741_v21, %v2039_v19  ;;  %v758_v48 = vadd.f32 %v742_v57, %v2043_v35  ;;  %v759_v52 = vadd.f32 %v743_v29, %v2047_v43  ;;  %v760_v24 = vadd.f32 %v744_v60, %v2051_v31 }
  0xee   : > { %v761_v17 = vadd.f32 %v745_v45, %v2055_v25  ;;  %v762_v18 = vadd.f32 %v746_v39, %v2059_v34  ;;  %v763_v59 = vadd.f32 %v747_v12, %v2063_v4  ;;  %v764_v3 = vadd.f32 %v748_v47, %v2067_v7 }
  0xef   : > { %v765_v20 = vadd.f32 %v749_v62, %v2071_v8  ;;  %v766_v15 = vadd.f32 %v750_v28, %v2651_v49  ;;  %v767_v19 = vadd.f32 %v751_v2, %v2652_v55  ;;  %v768_v35 = vadd.f32 %v752_v1, %v2653_v27 }
  0xf0   : > { %v769_v43 = vadd.f32 %v753_v13, %v2654_v11  ;;  %v770_v31 = vadd.f32 %v754_v14, %v2655_v0  ;;  %v771_v22 = vadd.f32 %v759_v52, %v755_v42  ;;  %v780_v25 = vadd.f32 %v760_v24, %v756_v9 }
  0xf1   : > { %v789_v56 = vadd.f32 %v761_v17, %v757_v6  ;;  %v798_v34 = vadd.f32 %v762_v18, %v758_v48  ;;  %v821_v28 = vlaneseq }
  0xf2   : > { %v772_v54 = vadd.f32 %v771_v22, %v763_v59  ;;  %v781_v4 = vadd.f32 %v780_v25, %v764_v3 }
  0xf3   : > { %v790_v36 = vadd.f32 %v789_v56, %v765_v20  ;;  %v799_v7 = vadd.f32 %v798_v34, %v766_v15  ;;  %vm823_vm3 = vcmp.lt.s32.totalorder %v821_v28, 512 }
  0xf4   : > { %v773_v38 = vadd.f32 %v772_v54, %v767_v19  ;;  %v782_v8 = vadd.f32 %v781_v4, %v768_v35 }
  0xf5   : > { %v791_v21 = vadd.f32 %v790_v36, %v769_v43  ;;  %v800_v16 = vadd.f32 %v799_v7, %v770_v31 }
  0xf6   : > { %v774_v57 = vrot.slane %v773_v38, 4  ;;  %v783_v10 = vrot.slane %v782_v8, 4 }
  0xf7   : > { %v792_v37 = vrot.slane %v791_v21, 4  ;;  %v801_v29 = vrot.slane %v800_v16, 4 }
  0xf8   : > { %v775_v41 = vadd.f32 %v774_v57, %v773_v38  ;;  %v784_v60 = vadd.f32 %v783_v10, %v782_v8 }
  0xf9   : > { %v793_v53 = vadd.f32 %v792_v37, %v791_v21  ;;  %v802_v51 = vadd.f32 %v801_v29, %v800_v16 }
  0xfa   : > { %v776_v45 = vrot.slane %v775_v41, 2  ;;  %v785_v30 = vrot.slane %v784_v60, 2 }
  0xfb   : > { %v794_v39 = vrot.slane %v793_v53, 2  ;;  %v803_v63 = vrot.slane %v802_v51, 2 }
  0xfc   : > { %v777_v26 = vadd.f32 %v776_v45, %v775_v41  ;;  %v786_v12 = vadd.f32 %v785_v30, %v784_v60 }
  0xfd   : > { %v795_v32 = vadd.f32 %v794_v39, %v793_v53  ;;  %v804_v47 = vadd.f32 %v803_v63, %v802_v51 }
  0xfe   : > { %v778_v50 = vrot.slane %v777_v26, 1  ;;  %v787_v58 = vrot.slane %v786_v12, 1 }
  0xff   : > { %v796_v62 = vrot.slane %v795_v32, 1  ;;  %v805_v23 = vrot.slane %v804_v47, 1 }
 0x100   : > { %v779_v40 = vadd.f32 %v778_v50, %v777_v26  ;;  %v788_v46 = vadd.f32 %v787_v58, %v786_v12 }
 0x101   : > { %v797_v2 = vadd.f32 %v796_v62, %v795_v32  ;;  %v806_v44 = vadd.f32 %v805_v23, %v804_v47 }
 0x102   : > { %v811_v1 = vrot.slane %v788_v46, 7 }
 0x103   : > { %v812_v33 = vrot.slane %v797_v2, 6  ;;  %v813_v61 = vrot.slane %v806_v44, 5 }
 0x104   : > { %v815_v13 = vsel %vm814_vm0, %v779_v40, %v811_v1 }
 0x105   : > { %v817_v5 = vsel %vm816_vm1, %v812_v33, %v813_v61 }
 0x106   : > { %v819_v14 = vsel %vm818_vm2, %v815_v13, %v817_v5 }
 0x107   : > { %825 = vst.msk [vmem:[%s475_s25] sm:$0xf] %vm823_vm3, %v819_v14 }
 0x108   : > { %1341 = shalt.err (!%p1338_p5)
}
 0x109   : > { %1072 = dma.vmem_to_hbm [thread:$0]  (%p1478_p11), %s840_s26, 64, %s842_s8, %s827_s3  }
 0x10a PF: > { %s2659_s30 = sld [smem:[#allocation19_spill]]  ;;  %p1094_p7 = pnand %p1023_p9, %p1482_p12 }
 0x10c   : > { %p1095_p8 = pneg %p1094_p7 }
 0x110   : > { %s853_s15 = sand.u32 1, %s2659_s30  }
 0x111   : > { %s854_s29 = scalar_lea.sflag [#allocation4], %s853_s15 }
 0x112   : > { %1375 = dma.done.wait (%p1095_p8), %s854_s29, 64  }
 0x113   : > { %1377 = vsyncadd (%p1095_p8), %s854_s29, 4294967232  ;;  %s2662_s24 = sld [smem:[#allocation22_spill]]  ;;  %s2665_s21 = smov %s1384_s22 }
 0x114   : > { %s2663_s17 = sld [smem:[#allocation20_spill]] }
 0x115   : > { %s2664_s23 = sld [smem:[#allocation23_spill]] }
 0x119   : > { %p28_p10 = scmp.ge.s32.totalorder %s2662_s24, 4  }
 0x11a   : > { %s2666_s22 = smov %s2663_s17 }
 0x11b   :  { %30 = sbr.rel (!%p28_p10) target bundleno = 15 (0xf), region = 150 }
 0x120   :  { %860 = vsyncpa [#allocation3], 1 }
 0x121   :  { %862 = vsyncpa [#allocation3 + $0x1], 1 }
 0x122   :  { %863 = vsyncpa [#allocation6], 1 }
 0x123   :  { %865 = vsyncpa [#allocation6 + $0x1], 1 }
 0x124   :  { %866 = vsyncpa [#allocation9], 1 }
 0x125   :  { %868 = vsyncpa [#allocation9 + $0x1], 1 }
 0x126   :  { %869 = vsyncpa [#allocation12], 1 }
 0x127   :  { %871 = vsyncpa [#allocation12 + $0x1], 1 }
 0x128   :  { %872 = vsyncpa [#allocation4], 1 }
 0x129   :  { %874 = vsyncpa [#allocation4 + $0x1], 1 }

</bundles_post_ra>
